<compile_context>
chip_gen: v7x
topology: tpu7x:2x2x1
jax: 0.10.0
libtpu: 0.0.40
codegen_flags: <defaults>
</compile_context>

<pallas_src>
import functools

import jax
import jax.numpy as jnp
from jax.experimental import pallas as pl
from jax.experimental.pallas import tpu as pltpu


HIDDEN1 = 64
HIDDEN2 = 32
LANE = 128             # vreg lane width / lane-dense padding target
SUBLANE = 8
DEFAULT_TILE_B = 4096  # max batch rows per grid step (multiple of 8)


def _round_up(n, m):
    return ((n + m - 1) // m) * m


def _pad_to(a, shape, dtype=None):
    pads = [(0, t - s) for s, t in zip(a.shape, shape)]
    out = jnp.pad(a, pads)
    return out.astype(dtype) if dtype is not None else out


def qnet_kernel(x_ref, w1_ref, b1_ref, w2_ref, b2_ref, w3_ref, b3_ref, out_ref):
    # fc1 + ReLU   (tb, num_inputs) @ (num_inputs, 128)  -> f32 acc
    h1 = jnp.dot(x_ref[...], w1_ref[...], preferred_element_type=jnp.float32)
    h1 = jnp.maximum(h1 + b1_ref[...], 0.0)
    # fc2 + ReLU   (tb, 128) @ (128, 128)
    h2 = jnp.dot(h1.astype(w2_ref.dtype), w2_ref[...],
                 preferred_element_type=jnp.float32)
    h2 = jnp.maximum(h2 + b2_ref[...], 0.0)
    # fc3          (tb, 128) @ (128, 128) internally; store only num_actions
    out = jnp.dot(h2.astype(w3_ref.dtype), w3_ref[...],
                  preferred_element_type=jnp.float32)
    na = out_ref.shape[1]
    out_ref[...] = out[:, :na] + b3_ref[...]


def prepare_params(params, compute_dtype=jnp.float32):
    """Pad (and optionally cast) weights/biases ONCE outside the forward path."""
    num_inputs = params["w1"].shape[0]
    num_actions = params["w3"].shape[1]
    h1p = _round_up(HIDDEN1, LANE)       # 128
    h2p = _round_up(HIDDEN2, LANE)       # 128
    nap = _round_up(num_actions, LANE)   # 128 (internal matmul width only)
    return {
        "w1": _pad_to(params["w1"], (num_inputs, h1p), compute_dtype),
        "b1": _pad_to(params["b1"], (1, h1p), jnp.float32),
        "w2": _pad_to(params["w2"], (h1p, h2p), compute_dtype),
        "b2": _pad_to(params["b2"], (1, h2p), jnp.float32),
        "w3": _pad_to(params["w3"], (h2p, nap), compute_dtype),
        "b3": params["b3"].astype(jnp.float32),   # (1, num_actions), un-padded
    }


@functools.partial(jax.jit, static_argnames=("tile_b",))
def qnetwork_forward(x, prepared, tile_b=DEFAULT_TILE_B):
    """x: (B, num_inputs); prepared: output of prepare_params()."""
    B, num_inputs = x.shape
    w1, b1, w2, b2, w3, b3 = (prepared[k]
                              for k in ("w1", "b1", "w2", "b2", "w3", "b3"))
    num_actions = b3.shape[1]
    h1p, h2p, nap = w1.shape[1], w2.shape[1], w3.shape[1]

    x = x.astype(w1.dtype)   # bf16 path halves the x HBM read; no-op for f32

    # Adaptive tiling:
    #   * size tb to the actual step count -> at most (tb-1) padded rows
    #   * force >=2 grid steps when possible so v7x megacore uses both TCs
    n_steps = max(1, -(-B // tile_b))
    if B > 2 * SUBLANE:
        n_steps = max(n_steps, 2)
    tb = _round_up(-(-B // n_steps), SUBLANE)
    b_pad = _round_up(B, tb)
    if b_pad != B:
        x = jnp.pad(x, ((0, b_pad - B), (0, 0)))
    grid = (b_pad // tb,)

    batch_spec = lambda cols: pl.BlockSpec((tb, cols), lambda i: (i, 0))
    resident = lambda arr: pl.BlockSpec(arr.shape, lambda i: (0, 0))

    w_bytes = jnp.dtype(w1.dtype).itemsize
    cost = pl.CostEstimate(
        flops=2 * b_pad * (num_inputs * h1p + h1p * h2p + h2p * nap),
        transcendentals=0,
        bytes_accessed=(b_pad * num_inputs * w_bytes           # x read
                        + b_pad * num_actions * 4              # narrow out write
                        + (w1.size + w2.size + w3.size) * w_bytes
                        + (b1.size + b2.size + b3.size) * 4),
    )

    out = pl.pallas_call(
        qnet_kernel,
        out_shape=jax.ShapeDtypeStruct((b_pad, num_actions), jnp.float32),
        grid=grid,
        in_specs=[
            batch_spec(num_inputs),          # x: tiled over batch
            resident(w1), resident(b1),      # weights/biases: resident in VMEM
            resident(w2), resident(b2),
            resident(w3), resident(b3),
        ],
        out_specs=batch_spec(num_actions),   # narrow (tb, num_actions) writeback
        compiler_params=pltpu.CompilerParams(
            dimension_semantics=("parallel",),   # megacore shard on v7x
            vmem_limit_bytes=32 * 1024 * 1024,   # raise v5e's 16 MiB scoped default
        ),
        cost_estimate=cost,
    )(x, w1, b1, w2, b2, w3, b3)

    return out[:B] if b_pad != B else out


def init_params(key, num_inputs, num_actions):
    """Deterministic init mimicking nn.Linear default (uniform +/- 1/sqrt(fan_in))."""
    def linear(key, fan_in, fan_out):
        kw, kb = jax.random.split(key)
        bound = 1.0 / jnp.sqrt(fan_in)
        w = jax.random.uniform(kw, (fan_in, fan_out), jnp.float32, -bound, bound)
        b = jax.random.uniform(kb, (1, fan_out), jnp.float32, -bound, bound)
        return w, b

    k1, k2, k3 = jax.random.split(key, 3)
    w1, b1 = linear(k1, num_inputs, HIDDEN1)
    w2, b2 = linear(k2, HIDDEN1, HIDDEN2)
    w3, b3 = linear(k3, HIDDEN2, num_actions)
    return {"w1": w1, "b1": b1, "w2": w2, "b2": b2, "w3": w3, "b3": b3}


def reference_forward(x, p):
    h1 = jnp.maximum(x @ p["w1"] + p["b1"], 0.0)
    h2 = jnp.maximum(h1 @ p["w2"] + p["b2"], 0.0)
    return h2 @ p["w3"] + p["b3"]


if __name__ == "__main__":
    key = jax.random.PRNGKey(0)
    k_params, k_x = jax.random.split(key)

    num_inputs = 8     # small observation dim
    num_actions = 4
    batch = 8

    params = init_params(k_params, num_inputs, num_actions)
    x = jax.random.normal(k_x, (batch, num_inputs), jnp.float32)

    # f32 path (default): matches the f32 reference within 1e-5.
    prepared_f32 = prepare_params(params, jnp.float32)
    out = jax.block_until_ready(qnetwork_forward(x, prepared_f32))
    ref = reference_forward(x, params)
    assert out.shape == (batch, num_actions)
    assert jnp.allclose(out, ref, atol=1e-5, rtol=1e-5)

    # batch that is not a multiple of the sublane/tile width
    x2 = jax.random.normal(jax.random.PRNGKey(1), (13, num_inputs), jnp.float32)
    out2 = jax.block_until_ready(qnetwork_forward(x2, prepared_f32))
    assert out2.shape == (13, num_actions)
    assert jnp.allclose(out2, reference_forward(x2, params), atol=1e-5, rtol=1e-5)

    # larger batch exercising a multi-step grid (>=2 steps -> megacore on v7x)
    # and the "size tb to the step count" padding fix (no wasted rows here).
    x3 = jax.random.normal(jax.random.PRNGKey(2), (1056, num_inputs), jnp.float32)
    out3 = jax.block_until_ready(qnetwork_forward(x3, prepared_f32, tile_b=512))
    assert out3.shape == (1056, num_actions)
    assert jnp.allclose(out3, reference_forward(x3, params), atol=1e-4, rtol=1e-4)

    # optional bf16-MXU path (faster matmuls, f32 accumulation, looser tolerance)
    prepared_bf16 = prepare_params(params, jnp.bfloat16)
    out_bf16 = jax.block_until_ready(qnetwork_forward(x, prepared_bf16))
    assert out_bf16.shape == (batch, num_actions)
    assert jnp.allclose(out_bf16, ref, atol=5e-2, rtol=5e-2)

    print("KERNEL_OK")
</pallas_src>

<mosaic_0001>
module attributes {stable_mosaic.version = 11 : i64} {
  func.func @qnet_kernel(%arg0: i32, %arg1: memref<8x8xf32, #tpu.memory_space<vmem>>, %arg2: memref<8x128xf32, #tpu.memory_space<vmem>>, %arg3: memref<1x128xf32, #tpu.memory_space<vmem>>, %arg4: memref<128x128xf32, #tpu.memory_space<vmem>>, %arg5: memref<1x128xf32, #tpu.memory_space<vmem>>, %arg6: memref<128x128xf32, #tpu.memory_space<vmem>>, %arg7: memref<1x4xf32, #tpu.memory_space<vmem>>, %arg8: memref<8x4xf32, #tpu.memory_space<vmem>>) attributes {dimension_semantics = [#tpu.dimension_semantics<parallel>], iteration_bounds = array<i64: 1>, scalar_prefetch = 0 : i64, scratch_operands = 0 : i64, tpu.core_type = #tpu.core_type<tc>, window_params = [{transform_indices = @transform_0, window_bounds = array<i64: 8, 8>}, {pipeline_mode = #tpu.pipeline_mode<synchronous>, transform_indices = @transform_1, window_bounds = array<i64: 8, 128>}, {pipeline_mode = #tpu.pipeline_mode<synchronous>, transform_indices = @transform_2, window_bounds = array<i64: 1, 128>}, {pipeline_mode = #tpu.pipeline_mode<synchronous>, transform_indices = @transform_3, window_bounds = array<i64: 128, 128>}, {pipeline_mode = #tpu.pipeline_mode<synchronous>, transform_indices = @transform_4, window_bounds = array<i64: 1, 128>}, {pipeline_mode = #tpu.pipeline_mode<synchronous>, transform_indices = @transform_5, window_bounds = array<i64: 128, 128>}, {pipeline_mode = #tpu.pipeline_mode<synchronous>, transform_indices = @transform_6, window_bounds = array<i64: 1, 4>}, {transform_indices = @transform_7, window_bounds = array<i64: 8, 4>}]} {
    %c0 = arith.constant 0 : index
    %c0_0 = arith.constant 0 : index
    %0 = vector.load %arg1[%c0, %c0_0] : memref<8x8xf32, #tpu.memory_space<vmem>>, vector<8x8xf32>
    %c0_1 = arith.constant 0 : index
    %c0_2 = arith.constant 0 : index
    %1 = vector.load %arg2[%c0_1, %c0_2] : memref<8x128xf32, #tpu.memory_space<vmem>>, vector<8x128xf32>
    %cst = arith.constant dense<0.000000e+00> : vector<8x128xf32>
    %2 = tpu.matmul %0, %1, %cst {dimension_numbers = #tpu.dot_dimension_numbers<[1], [0], [0], [1], [0, 0, 1, 1], [], []>} : vector<8x8xf32>, vector<8x128xf32>, vector<8x128xf32> -> vector<8x128xf32>
    %c0_3 = arith.constant 0 : index
    %c0_4 = arith.constant 0 : index
    %3 = vector.load %arg3[%c0_3, %c0_4] : memref<1x128xf32, #tpu.memory_space<vmem>>, vector<1x128xf32>
    %4 = vector.broadcast %3 : vector<1x128xf32> to vector<8x128xf32>
    %5 = arith.addf %2, %4 : vector<8x128xf32>
    %cst_5 = arith.constant 0.000000e+00 : f32
    %6 = vector.broadcast %cst_5 : f32 to vector<8x128xf32>
    %7 = arith.maximumf %5, %6 : vector<8x128xf32>
    %c0_6 = arith.constant 0 : index
    %c0_7 = arith.constant 0 : index
    %8 = vector.load %arg4[%c0_6, %c0_7] : memref<128x128xf32, #tpu.memory_space<vmem>>, vector<128x128xf32>
    %cst_8 = arith.constant dense<0.000000e+00> : vector<8x128xf32>
    %9 = tpu.matmul %7, %8, %cst_8 {dimension_numbers = #tpu.dot_dimension_numbers<[1], [0], [0], [1], [0, 0, 1, 1], [], []>} : vector<8x128xf32>, vector<128x128xf32>, vector<8x128xf32> -> vector<8x128xf32>
    %c0_9 = arith.constant 0 : index
    %c0_10 = arith.constant 0 : index
    %10 = vector.load %arg5[%c0_9, %c0_10] : memref<1x128xf32, #tpu.memory_space<vmem>>, vector<1x128xf32>
    %11 = vector.broadcast %10 : vector<1x128xf32> to vector<8x128xf32>
    %12 = arith.addf %9, %11 : vector<8x128xf32>
    %cst_11 = arith.constant 0.000000e+00 : f32
    %13 = vector.broadcast %cst_11 : f32 to vector<8x128xf32>
    %14 = arith.maximumf %12, %13 : vector<8x128xf32>
    %c0_12 = arith.constant 0 : index
    %c0_13 = arith.constant 0 : index
    %15 = vector.load %arg6[%c0_12, %c0_13] : memref<128x128xf32, #tpu.memory_space<vmem>>, vector<128x128xf32>
    %cst_14 = arith.constant dense<0.000000e+00> : vector<8x128xf32>
    %16 = tpu.matmul %14, %15, %cst_14 {dimension_numbers = #tpu.dot_dimension_numbers<[1], [0], [0], [1], [0, 0, 1, 1], [], []>} : vector<8x128xf32>, vector<128x128xf32>, vector<8x128xf32> -> vector<8x128xf32>
    %17 = vector.extract_strided_slice %16 {offsets = [0, 0], sizes = [8, 4], strides = [1, 1]} : vector<8x128xf32> to vector<8x4xf32>
    %c0_15 = arith.constant 0 : index
    %c0_16 = arith.constant 0 : index
    %18 = vector.load %arg7[%c0_15, %c0_16] : memref<1x4xf32, #tpu.memory_space<vmem>>, vector<1x4xf32>
    %19 = vector.broadcast %18 : vector<1x4xf32> to vector<8x4xf32>
    %20 = arith.addf %17, %19 : vector<8x4xf32>
    %c0_17 = arith.constant 0 : index
    %c0_18 = arith.constant 0 : index
    %21 = vector.load %arg8[%c0_17, %c0_18] : memref<8x4xf32, #tpu.memory_space<vmem>>, vector<8x4xf32>
    tpu.vector_store %arg8[%c0_17, %c0_18], %20 {strides = array<i32>} : memref<8x4xf32, #tpu.memory_space<vmem>>, vector<8x4xf32>,
    return
  }
  func.func @transform_0(%arg0: i32) -> (i32, i32) {
    %c0_i32 = arith.constant 0 : i32
    %c0_i32_0 = arith.constant 0 : i32
    return %arg0, %c0_i32 : i32, i32
  }
  func.func @transform_1(%arg0: i32) -> (i32, i32) {
    %c0_i32 = arith.constant 0 : i32
    %c0_i32_0 = arith.constant 0 : i32
    %c0_i32_1 = arith.constant 0 : i32
    return %c0_i32, %c0_i32_0 : i32, i32
  }
  func.func @transform_2(%arg0: i32) -> (i32, i32) {
    %c0_i32 = arith.constant 0 : i32
    %c0_i32_0 = arith.constant 0 : i32
    %c0_i32_1 = arith.constant 0 : i32
    return %c0_i32, %c0_i32_0 : i32, i32
  }
  func.func @transform_3(%arg0: i32) -> (i32, i32) {
    %c0_i32 = arith.constant 0 : i32
    %c0_i32_0 = arith.constant 0 : i32
    %c0_i32_1 = arith.constant 0 : i32
    return %c0_i32, %c0_i32_0 : i32, i32
  }
  func.func @transform_4(%arg0: i32) -> (i32, i32) {
    %c0_i32 = arith.constant 0 : i32
    %c0_i32_0 = arith.constant 0 : i32
    %c0_i32_1 = arith.constant 0 : i32
    return %c0_i32, %c0_i32_0 : i32, i32
  }
  func.func @transform_5(%arg0: i32) -> (i32, i32) {
    %c0_i32 = arith.constant 0 : i32
    %c0_i32_0 = arith.constant 0 : i32
    %c0_i32_1 = arith.constant 0 : i32
    return %c0_i32, %c0_i32_0 : i32, i32
  }
  func.func @transform_6(%arg0: i32) -> (i32, i32) {
    %c0_i32 = arith.constant 0 : i32
    %c0_i32_0 = arith.constant 0 : i32
    %c0_i32_1 = arith.constant 0 : i32
    return %c0_i32, %c0_i32_0 : i32, i32
  }
  func.func @transform_7(%arg0: i32) -> (i32, i32) {
    %c0_i32 = arith.constant 0 : i32
    %c0_i32_0 = arith.constant 0 : i32
    return %arg0, %c0_i32 : i32, i32
  }
}

</mosaic_0001>

<bundles_post_ra>
// kernel: qnetwork_forward.1
= control target key start
LH: loop header
LB: loop body
LE: loop exit
PB: predicated region body
PF: predicated region fallthrough
CT: control target
= control target key end

     0   :  { %12 = vsyncpa [#allocation3], 0  ;;  %s710_s0 = inlined_call_operand.hbm [shape: f32[8,8], index: 0, kind: input, shape index: {}]   ;;  %s711_s1 = inlined_call_operand.vmem [shape: f32[8,128], index: 1, kind: input, shape index: {}]   ;;  %s712_s2 = inlined_call_operand.vmem [shape: f32[1,128], index: 2, kind: input, shape index: {}]   ;;  %s713_s3 = inlined_call_operand.hbm [shape: f32[128,128], index: 3, kind: input, shape index: {}]   ;;  %s714_s4 = inlined_call_operand.vmem [shape: f32[1,128], index: 4, kind: input, shape index: {}]   ;;  %s715_s5 = inlined_call_operand.hbm [shape: f32[128,128], index: 5, kind: input, shape index: {}]   ;;  %s716_s6 = inlined_call_operand.vmem [shape: f32[1,4], index: 6, kind: input, shape index: {}]   ;;  %s717_s7 = inlined_call_operand.vmem [shape: f32[8,4], index: 7, kind: output, shape index: {}]  }
   0x1   :  { %13 = vsyncpa [#allocation5], 0  ;;  %s586_s24 = smov [#allocation4]   ;;  %s516_s28 = scalar_lea.hbm %s713_s3, 2048 }
   0x2   :  { %s33_s25 = sshll.u32 %s586_s24, 4  ;;  %p517_p0 = scmp.ne.s32.totalorder %s713_s3, %s516_s28  ;;  %s34_s25 = int_to_ptr.vmem [resolvable:$true] %s33_s25 }
   0x3   :  { %p520_p1 = scmp.lt.u32.totalorder %s516_s28, %s713_s3 }
   0x5   :  { %p522_p2 = pnand %p520_p1, %p517_p0 }
   0x7   :  { %525 = shalt.err (!%p522_p2)
}
   0x8   :  { %s526_s10 = scalar_lea.vmem %s34_s25, 2048  ;;  %p531_p4 = scmp.lt.s32.totalorder %s34_s25, %s34_s25 }
   0x9   :  { %p527_p3 = scmp.ne.s32.totalorder %s34_s25, %s526_s10  ;;  %p532_p5 = scmp.lt.s32.totalorder %s526_s10, %s526_s10 }
   0xb   :  { %p533_p6 = por %p532_p5, %p531_p4 }
   0xd   :  { %p534_p7 = pnand %p533_p6, %p527_p3 }
   0xf   :  { %537 = shalt.err (!%p534_p7)
}
  0x10   :  { %s587_s11 = smov 128   ;;  %s588_s12 = smov 8  }
  0x11   :  { %39 = dma.hbm_to_vmem [thread:$0]  %s713_s3, 2048, %s34_s25, [#allocation5], %s587_s11, %s587_s11, %s588_s12  }
  0x12   :  { %s589_s15 = smov [#allocation2]   ;;  %s590_s17 = smov [#allocation6]  }
  0x13   :  { %s20_s16 = sshll.u32 %s589_s15, 4  ;;  %s47_s18 = sshll.u32 %s590_s17, 4  ;;  %s21_s16 = int_to_ptr.vmem [resolvable:$true] %s20_s16  ;;  %s48_s18 = int_to_ptr.vmem [resolvable:$true] %s47_s18 }
  0x14   :  { %s538_s21 = scalar_lea.hbm %s710_s0, 128 }
  0x15   :  { %p539_p8 = scmp.ne.s32.totalorder %s710_s0, %s538_s21  ;;  %p542_p9 = scmp.lt.u32.totalorder %s538_s21, %s710_s0 }
  0x17   :  { %p544_p10 = pnand %p542_p9, %p539_p8 }
  0x19   :  { %547 = shalt.err (!%p544_p10)
}
  0x1a   :  { %s548_s3 = scalar_lea.vmem %s21_s16, 128  ;;  %p553_p12 = scmp.lt.s32.totalorder %s21_s16, %s21_s16 }
  0x1b   :  { %p549_p11 = scmp.ne.s32.totalorder %s21_s16, %s548_s3  ;;  %p554_p13 = scmp.lt.s32.totalorder %s548_s3, %s548_s3 }
  0x1d   :  { %p555_p0 = por %p554_p13, %p553_p12 }
  0x1f   :  { %p556_p1 = pnand %p555_p0, %p549_p11 }
  0x21   :  { %559 = shalt.err (!%p556_p1)
}
  0x22   :  { %23 = dma.hbm_to_vmem [thread:$0]  %s710_s0, 128, %s21_s16, [#allocation3]  }
  0x23   :  { %s560_s30 = scalar_lea.hbm %s715_s5, 2048 }
  0x24   :  { %p561_p2 = scmp.ne.s32.totalorder %s715_s5, %s560_s30  ;;  %p564_p3 = scmp.lt.u32.totalorder %s560_s30, %s715_s5 }
  0x26   :  { %p566_p4 = pnand %p564_p3, %p561_p2 }
  0x28   :  { %569 = shalt.err (!%p566_p4)
}
  0x29   :  { %s570_s14 = scalar_lea.vmem %s48_s18, 2048  ;;  %p575_p6 = scmp.lt.s32.totalorder %s48_s18, %s48_s18 }
  0x2a   :  { %p571_p5 = scmp.ne.s32.totalorder %s48_s18, %s570_s14  ;;  %p576_p7 = scmp.lt.s32.totalorder %s570_s14, %s570_s14 }
  0x2c   :  { %p577_p8 = por %p576_p7, %p575_p6 }
  0x2e   :  { %p578_p9 = pnand %p577_p8, %p571_p5 }
  0x30   :  { %581 = shalt.err (!%p578_p9)
}
  0x31   :  { %53 = dma.hbm_to_vmem [thread:$0]  %s715_s5, 2048, %s48_s18, [#allocation5], %s587_s11, %s587_s11, %s588_s12  }
  0x32   :  { %582 = dma.done.wait [#allocation3], 128  }
  0x33   :  { %583 = vsyncadd [#allocation3], 4294967168 }
  0x34   :  { %584 = dma.done.wait [#allocation5], 4096  }
  0x35   :  { %585 = vsyncadd [#allocation5], 4294963200  ;;  %v591_v0 = vmov 0.0   ;;  %vm592_vm0 = vmmov 0   ;;  %v593_v1 = vmov 0.0|0.0   ;;  %vm74_vm1 = vcmask 64512  }
  0x36   :  { %385 = vmatprep.subr.mxu0 %v591_v0  ;;  %387 = vmatprep.mubr.msk.f32.mxu0 %vm592_vm0, %v591_v0  ;;  %v66_v2 = vld [vmem:[%s711_s1] sm:$0xff]  ;;  %v149_v4 = vld [vmem:[#allocation4] sm:$0xff]  ;;  %v150_v5 = vld [vmem:[#allocation4 + $0x8] sm:$0xff]  ;;  %vm337_vm2 = vcmask 31744  }
  0x37   :  { %460 = vmatprep.subr.bf16.mxu1 %v593_v1  ;;  %422 = vmatprep.mubr.msk.f32.mxu1 %vm592_vm0, %v591_v0  ;;  %v65_v3 = vld [vmem:[#allocation2] sm:$0xff]  ;;  %v151_v6 = vld [vmem:[#allocation4 + $0x10] sm:$0xff]  ;;  %v461_v8 = vpack.c.bf16 %v150_v5, %v149_v4  ;;  %v153_v10 = vld [vmem:[#allocation4 + $0x20] sm:$0xff] }
  0x38   :  { %386 = vmatpush3.msra.mxu0 %v66_v2  ;;  %v152_v7 = vld [vmem:[#allocation4 + $0x18] sm:$0xff]  ;;  %v154_v11 = vld [vmem:[#allocation4 + $0x28] sm:$0xff]  ;;  %v155_v13 = vld [vmem:[#allocation4 + $0x30] sm:$0xff] }
  0x39   :  { %388 = vmatmul.mubr.msk.f32.vlgmr.msra.gmra.mrb[0].mxu0 %vm74_vm1, %v65_v3  ;;  %484 = vmatprep.subr.bf16.mxu0 %v593_v1  ;;  %v464_v9 = vpack.c.bf16 %v152_v7, %v151_v6  ;;  %v467_v12 = vpack.c.bf16 %v154_v11, %v153_v10  ;;  %v156_v14 = vld [vmem:[#allocation4 + $0x38] sm:$0xff]  ;;  %v157_v16 = vld [vmem:[#allocation4 + $0x40] sm:$0xff]  ;;  %v158_v17 = vld [vmem:[#allocation4 + $0x48] sm:$0xff] }
  0x3a   :  { %457 = vmatprep.mubr.msk.f32.mxu0 %vm592_vm0, %v591_v0  ;;  %462 = vmatpush3.bf16.msra.mxu1 %v461_v8  ;;  %v470_v15 = vpack.c.bf16 %v156_v14, %v155_v13  ;;  %v473_v18 = vpack.c.bf16 %v158_v17, %v157_v16  ;;  %v159_v19 = vld [vmem:[#allocation4 + $0x50] sm:$0xff]  ;;  %v160_v20 = vld [vmem:[#allocation4 + $0x58] sm:$0xff]  ;;  %v161_v22 = vld [vmem:[#allocation4 + $0x60] sm:$0xff] }
  0x3b   :  { %463 = vmatprep.subr.bf16.mxu1 %v593_v1  ;;  %v476_v21 = vpack.c.bf16 %v160_v20, %v159_v19  ;;  %v162_v23 = vld [vmem:[#allocation4 + $0x68] sm:$0xff]  ;;  %v163_v25 = vld [vmem:[#allocation4 + $0x70] sm:$0xff]  ;;  %v164_v26 = vld [vmem:[#allocation4 + $0x78] sm:$0xff] }
  0x3c   :  { %v479_v24 = vpack.c.bf16 %v162_v23, %v161_v22  ;;  %v482_v27 = vpack.c.bf16 %v164_v26, %v163_v25  ;;  %v243_v28 = vld [vmem:[#allocation6] sm:$0xff]  ;;  %v244_v29 = vld [vmem:[#allocation6 + $0x8] sm:$0xff]  ;;  %v245_v30 = vld [vmem:[#allocation6 + $0x10] sm:$0xff] }
  0x3d   :  { %v485_v31 = vpack.c.bf16 %v244_v29, %v243_v28  ;;  %v246_v32 = vld [vmem:[#allocation6 + $0x18] sm:$0xff]  ;;  %v247_v34 = vld [vmem:[#allocation6 + $0x20] sm:$0xff]  ;;  %v248_v35 = vld [vmem:[#allocation6 + $0x28] sm:$0xff] }
  0x3e   :  { %465 = vmatpush3.bf16.msra.mxu1 %v464_v9  ;;  %v488_v33 = vpack.c.bf16 %v246_v32, %v245_v30  ;;  %v491_v36 = vpack.c.bf16 %v248_v35, %v247_v34  ;;  %v249_v37 = vld [vmem:[#allocation6 + $0x30] sm:$0xff]  ;;  %v250_v38 = vld [vmem:[#allocation6 + $0x38] sm:$0xff]  ;;  %v251_v40 = vld [vmem:[#allocation6 + $0x40] sm:$0xff] }
  0x3f   :  { %466 = vmatprep.subr.bf16.mxu1 %v593_v1  ;;  %486 = vmatpush3.bf16.msra.mxu0 %v485_v31  ;;  %v494_v39 = vpack.c.bf16 %v250_v38, %v249_v37  ;;  %v252_v41 = vld [vmem:[#allocation6 + $0x48] sm:$0xff]  ;;  %v253_v43 = vld [vmem:[#allocation6 + $0x50] sm:$0xff]  ;;  %v254_v44 = vld [vmem:[#allocation6 + $0x58] sm:$0xff] }
  0x40   :  { %487 = vmatprep.subr.bf16.mxu0 %v593_v1  ;;  %v497_v42 = vpack.c.bf16 %v252_v41, %v251_v40  ;;  %v500_v45 = vpack.c.bf16 %v254_v44, %v253_v43  ;;  %v255_v46 = vld [vmem:[#allocation6 + $0x60] sm:$0xff]  ;;  %v256_v47 = vld [vmem:[#allocation6 + $0x68] sm:$0xff]  ;;  %v345_v49 = vld [vmem:[%s712_s2] ss:$0 sm:$0xff] }
  0x41   :  { %v503_v48 = vpack.c.bf16 %v256_v47, %v255_v46  ;;  %v257_v54 = vld [vmem:[#allocation6 + $0x70] sm:$0xff]  ;;  %v258_v55 = vld [vmem:[#allocation6 + $0x78] sm:$0xff] }
  0x42   :  { %468 = vmatpush3.bf16.msra.mxu1 %v467_v12  ;;  %v506_v56 = vpack.c.bf16 %v258_v55, %v257_v54  ;;  %v347_v57 = vld [vmem:[%s714_s4] ss:$0 sm:$0xff] }
  0x43   :  { %469 = vmatprep.subr.bf16.mxu1 %v593_v1  ;;  %489 = vmatpush3.bf16.msra.mxu0 %v488_v33  ;;  %v348_v62 = vld [vmem:[%s716_s6] ss:$0 sm:$0xff] }
  0x44   :  { %490 = vmatprep.subr.bf16.mxu0 %v593_v1 }
  0x46   :  { %471 = vmatpush3.bf16.msra.mxu1 %v470_v15 }
  0x47   :  { %472 = vmatprep.subr.bf16.mxu1 %v593_v1  ;;  %492 = vmatpush3.bf16.msra.mxu0 %v491_v36 }
  0x48   :  { %493 = vmatprep.subr.bf16.mxu0 %v593_v1 }
  0x4a   :  { %474 = vmatpush3.bf16.msra.mxu1 %v473_v18 }
  0x4b   :  { %475 = vmatprep.subr.bf16.mxu1 %v593_v1  ;;  %495 = vmatpush3.bf16.msra.mxu0 %v494_v39 }
  0x4c   :  { %496 = vmatprep.subr.bf16.mxu0 %v593_v1 }
  0x4e   :  { %477 = vmatpush3.bf16.msra.mxu1 %v476_v21 }
  0x4f   :  { %478 = vmatprep.subr.bf16.mxu1 %v593_v1  ;;  %498 = vmatpush3.bf16.msra.mxu0 %v497_v42 }
  0x50   :  { %499 = vmatprep.subr.bf16.mxu0 %v593_v1 }
  0x52   :  { %480 = vmatpush3.bf16.msra.mxu1 %v479_v24 }
  0x53   :  { %481 = vmatprep.subr.bf16.mxu1 %v593_v1  ;;  %501 = vmatpush3.bf16.msra.mxu0 %v500_v45 }
  0x54   :  { %502 = vmatprep.subr.bf16.mxu0 %v593_v1 }
  0x56   :  { %483 = vmatpush3.bf16.msra.mxu1 %v482_v27 }
  0x57   :  { %504 = vmatpush3.bf16.msra.mxu0 %v503_v48 }
  0x58   :  { %505 = vmatprep.subr.bf16.mxu0 %v593_v1 }
  0x5b   :  { %507 = vmatpush3.bf16.msra.mxu0 %v506_v56 }
 0x10c   :  { %v144_v50 = vpop.f32.mrb[0].mxu0 }
 0x10d   :  { %v145_v51 = vadd.f32 %v345_v49, %v144_v50  ;;  %v389_v52 = vpop.f32.mrb[1].mxu0 }
 0x10f   :  { %v148_v53 = vmax.f32 %v145_v51, 0.0 }
 0x111   :  { %423 = vmatmul.mubr.f32.vlgmr.msra.gmra.mrb[0].mxu1 %v148_v53 }
 0x1e4   :  { %v238_v58 = vpop.f32.mrb[0].mxu1 }
 0x1e5   :  { %v239_v59 = vadd.f32 %v347_v57, %v238_v58  ;;  %v424_v60 = vpop.f32.mrb[1].mxu1 }
 0x1e7   :  { %v242_v61 = vmax.f32 %v239_v59, 0.0 }
 0x1e9   :  { %458 = vmatmul.mubr.f32.vlgmr.msra.gmra.mrb[2].mxu0 %v242_v61 }
 0x2bc   :  { %v325_v63 = vpop.f32.mrb[2].mxu0 }
 0x2bd   :  { %v336_v0 = vadd.f32 %v348_v62, %v325_v63  ;;  %v459_v1 = vpop.f32.mrb[3].mxu0 }
 0x2bf   :  { %338 = vst.msk [vmem:[%s717_s7] sm:$0xff] %vm337_vm2, %v336_v0 }
 0x2c0   :  { %343 = vsyncpa [#allocation3], 1 }
 0x2c1   :  { %344 = vsyncpa [#allocation5], 1 }

</bundles_post_ra>
